<compile_context>
chip_gen: v7x
topology: tpu7x:2x2x1
jax: 0.10.0
libtpu: 0.0.40
codegen_flags: <defaults>
</compile_context>

<pallas_src>
import functools

import jax
import jax.numpy as jnp
from jax.experimental import pallas as pl
from jax.experimental.pallas import tpu as pltpu

_LANE = 128


def _round_up(x, m):
    return (x + m - 1) // m * m


def _sublane_pack(itemsize):
    # Sublane packing factor for VMEM buffer-size estimates.
    return {4: 8, 2: 16, 1: 32}.get(itemsize, 8)


_TARGET_CACHE = []


def _target_block_bytes():
    """Per-block HBM->VMEM target: 8 MiB on 128 MiB-VMEM chips, 4 MiB on v7x."""
    if not _TARGET_CACHE:
        try:
            cap = pltpu.get_tpu_info().vmem_capacity_bytes
        except Exception:  # pragma: no cover - conservative fallback
            cap = 64 << 20
        _TARGET_CACHE.append((8 << 20) if cap >= (96 << 20) else (4 << 20))
    return _TARGET_CACHE[0]


# ----------------------------------------------------------------------------
# Path A: small feature maps — batch-blocked, full spatial extent per block.
# ----------------------------------------------------------------------------
def _se_batched_kernel(x_ref, w1t_ref, b1_ref, w2t_ref, b2_ref, o_ref, *, inv_hw):
    """One grid step handles BB full samples.

    x_ref  : (BB, C, HW)  input block (input dtype)
    w1t_ref: (C, hidden)  fc1 weight, transposed (f32)
    b1_ref : (1, hidden)  fc1 bias (f32)
    w2t_ref: (hidden, C)  fc2 weight, transposed (f32)
    b2_ref : (1, C)       fc2 bias (f32)
    o_ref  : (BB, C)      lane-dense SE weights
    """
    x = x_ref[...].astype(jnp.float32)                       # (BB, C, HW)
    mean = jnp.sum(x, axis=-1) * inv_hw                      # (BB, C)
    h = jnp.dot(mean, w1t_ref[...],
                preferred_element_type=jnp.float32) + b1_ref[...]
    h = jnp.maximum(h, 0.0)                                  # (BB, hidden)
    z = jnp.dot(h, w2t_ref[...],
                preferred_element_type=jnp.float32) + b2_ref[...]
    o_ref[...] = jax.nn.sigmoid(z).astype(o_ref.dtype)       # (BB, C)


# ----------------------------------------------------------------------------
# Path B: large feature maps — per-sample spatial tiling, tail masked in-kernel.
# ----------------------------------------------------------------------------
def _se_spatial_kernel(x_ref, w1_ref, b1_ref, w2_ref, b2_ref, o_ref, acc_ref,
                       *, inv_hw, tile, valid_tail, n_tiles):
    """One (batch, spatial-tile) grid step.

    x_ref  : (1, C, T)    input tile (input dtype); last tile may be partial
    w1_ref : (hidden, C)  fc1 weight (f32);  b1_ref: (hidden, 1)
    w2_ref : (C, hidden)  fc2 weight (f32);  b2_ref: (C, 1)
    o_ref  : (1, C, 1)    SE weights for this sample (output bytes are tiny here)
    acc_ref: (C, 128) f32 lane-dense running partial sums (VMEM scratch)
    """
    k = pl.program_id(1)
    n_last = n_tiles - 1
    n_chunks = tile // _LANE

    def partial_sum(mask_tail):
        # Sum this (C, T) tile into (C, 128) partials with 128-lane VMEM loads
        # and plain VPU adds — the cross-lane XLU reduce happens once at the end.
        s = None
        for i in range(n_chunks):
            lo = i * _LANE
            if mask_tail and lo >= valid_tail:
                break                                  # fully out-of-range chunk
            c = x_ref[0, :, lo:lo + _LANE].astype(jnp.float32)   # (C, 128)
            if mask_tail and lo + _LANE > valid_tail:
                # Partial chunk: zero lanes beyond the true H*W (they hold
                # whatever stale/garbage data the clipped DMA left behind).
                lane = jax.lax.broadcasted_iota(jnp.int32, c.shape, 1)
                c = jnp.where(lane < (valid_tail - lo), c, 0.0)
            s = c if s is None else s + c
        return s

    if n_tiles > 1:
        @pl.when(k == 0)
        def _init():
            acc_ref[...] = jnp.zeros_like(acc_ref)

        @pl.when(k != n_last)
        def _full_tile():
            acc_ref[...] += partial_sum(False)

    @pl.when(k == n_last)
    def _tail_and_finish():
        tail = partial_sum(True)                               # (C, 128)
        total = (acc_ref[...] + tail) if n_tiles > 1 else tail
        # True-HW mean (not the padded tile length).
        mean = jnp.sum(total, axis=-1, keepdims=True) * inv_hw  # (C, 1)
        h = jnp.dot(w1_ref[...], mean,
                    preferred_element_type=jnp.float32) + b1_ref[...]
        h = jnp.maximum(h, 0.0)                                 # (hidden, 1)
        z = jnp.dot(w2_ref[...], h,
                    preferred_element_type=jnp.float32) + b2_ref[...]
        o_ref[0] = jax.nn.sigmoid(z).astype(o_ref.dtype)        # (C, 1)


# ----------------------------------------------------------------------------
# Wrapper
# ----------------------------------------------------------------------------
@functools.partial(jax.jit, static_argnames=("block_bytes",))
def se_weight_pallas(x, w1, b1, w2, b2, *, block_bytes=None):
    """x: (B, C, H, W); w1: (hidden, C); b1: (hidden,); w2: (C, hidden); b2: (C,).

    Returns the SE weight of shape (B, C, 1, 1), matching SEWeightModule.forward.
    `block_bytes` (static) overrides the per-block VMEM target (used for tests).
    """
    B, C, H, W = x.shape
    hidden = w1.shape[0]
    HW = H * W
    itemsize = x.dtype.itemsize
    target = int(block_bytes) if block_bytes is not None else _target_block_bytes()

    # Contiguous NCHW -> free reshape (no HBM copy).
    x_flat = x.reshape(B, C, HW)
    inv_hw = 1.0 / float(HW)

    sub = _sublane_pack(itemsize)
    # Padded-per-sample VMEM footprint of one (1, C, HW) slab.
    sample_buf_bytes = _round_up(C, sub) * _round_up(HW, _LANE) * itemsize

    if sample_buf_bytes <= target:
        # -------- Path A: batch-blocked, full spatial extent per block --------
        bb = max(1, min(B, target // sample_buf_bytes))
        # Prefer a batch block that divides B (no partial final block).  A
        # partial final block would still be correct — rows are independent
        # and out-of-range rows are dropped on writeback — but divisors avoid
        # moving garbage tail rows at all.
        div = next(d for d in range(bb, 0, -1) if B % d == 0)
        if 2 * div >= bb:
            bb = div
        n_b = pl.cdiv(B, bb)

        w1t = jnp.asarray(w1, jnp.float32).reshape(hidden, C).T   # (C, hidden)
        b1r = jnp.asarray(b1, jnp.float32).reshape(1, hidden)
        w2t = jnp.asarray(w2, jnp.float32).reshape(C, hidden).T   # (hidden, C)
        b2r = jnp.asarray(b2, jnp.float32).reshape(1, C)

        vmem_limit = int(min(max(2 * bb * sample_buf_bytes + (8 << 20),
                                 16 << 20), 56 << 20))

        kernel = functools.partial(_se_batched_kernel, inv_hw=inv_hw)
        out = pl.pallas_call(
            kernel,
            out_shape=jax.ShapeDtypeStruct((B, C), x.dtype),
            grid_spec=pltpu.PrefetchScalarGridSpec(
                num_scalar_prefetch=0,
                grid=(n_b,),
                in_specs=[
                    pl.BlockSpec((bb, C, HW), lambda i: (i, 0, 0)),   # x block
                    pl.BlockSpec((C, hidden), lambda i: (0, 0)),      # w1^T
                    pl.BlockSpec((1, hidden), lambda i: (0, 0)),      # b1
                    pl.BlockSpec((hidden, C), lambda i: (0, 0)),      # w2^T
                    pl.BlockSpec((1, C), lambda i: (0, 0)),           # b2
                ],
                out_specs=pl.BlockSpec((bb, C), lambda i: (i, 0)),
            ),
            compiler_params=pltpu.CompilerParams(
                dimension_semantics=("parallel",),
                vmem_limit_bytes=vmem_limit),
        )(x_flat, w1t, b1r, w2t, b2r)
        return out.reshape(B, C, 1, 1)

    # -------- Path B: per-sample spatial tiling (no wrapper-side pad) --------
    t_cap = max(_LANE,
                (target // max(1, _round_up(C, sub) * itemsize)) // _LANE * _LANE)
    n_k = pl.cdiv(HW, t_cap)                 # number of spatial tiles
    T = _round_up(pl.cdiv(HW, n_k), _LANE)   # lane-dense tile width (<= t_cap)
    valid_tail = HW - (n_k - 1) * T          # valid lanes in the last tile, in [1, T]

    w1f = jnp.asarray(w1, jnp.float32).reshape(hidden, C)
    b1c = jnp.asarray(b1, jnp.float32).reshape(hidden, 1)
    w2f = jnp.asarray(w2, jnp.float32).reshape(C, hidden)
    b2c = jnp.asarray(b2, jnp.float32).reshape(C, 1)

    x_block_bytes = _round_up(C, sub) * T * itemsize
    vmem_limit = int(min(max(2 * x_block_bytes + (8 << 20), 16 << 20), 56 << 20))

    kernel = functools.partial(_se_spatial_kernel, inv_hw=inv_hw, tile=T,
                               valid_tail=valid_tail, n_tiles=n_k)
    out = pl.pallas_call(
        kernel,
        out_shape=jax.ShapeDtypeStruct((B, C, 1), x.dtype),
        grid_spec=pltpu.PrefetchScalarGridSpec(
            num_scalar_prefetch=0,
            grid=(B, n_k),
            in_specs=[
                pl.BlockSpec((1, C, T), lambda b, k: (b, 0, k)),   # x tile
                pl.BlockSpec((hidden, C), lambda b, k: (0, 0)),    # w1
                pl.BlockSpec((hidden, 1), lambda b, k: (0, 0)),    # b1
                pl.BlockSpec((C, hidden), lambda b, k: (0, 0)),    # w2
                pl.BlockSpec((C, 1), lambda b, k: (0, 0)),         # b2
            ],
            out_specs=pl.BlockSpec((1, C, 1), lambda b, k: (b, 0, 0)),
            scratch_shapes=[pltpu.VMEM((C, _LANE), jnp.float32)],
        ),
        compiler_params=pltpu.CompilerParams(
            dimension_semantics=("parallel", "arbitrary"),
            vmem_limit_bytes=vmem_limit),
    )(x_flat, w1f, b1c, w2f, b2c)
    return out.reshape(B, C, 1, 1)


def se_weight_ref(x, w1, b1, w2, b2):
    """Pure-JAX reference matching SEWeightModule.forward."""
    y = jnp.mean(x, axis=(2, 3))                 # (B, C)  global avg pool
    h = jax.nn.relu(y @ w1.T + b1)               # (B, hidden)
    z = h @ w2.T + b2                            # (B, C)
    return jax.nn.sigmoid(z)[:, :, None, None]   # (B, C, 1, 1)


def init_params(key, channels, reduction=16):
    hidden = channels // reduction
    assert hidden >= 1, "channels must be >= reduction"
    k1, k2, k3, k4 = jax.random.split(key, 4)
    # Conv2d 1x1 weights collapsed to 2-D matrices, biases as vectors.
    w1 = jax.random.normal(k1, (hidden, channels), jnp.float32) * 0.1
    b1 = jax.random.normal(k2, (hidden,), jnp.float32) * 0.1
    w2 = jax.random.normal(k3, (channels, hidden), jnp.float32) * 0.1
    b2 = jax.random.normal(k4, (channels,), jnp.float32) * 0.1
    return w1, b1, w2, b2


if __name__ == "__main__":
    # channels must be >= reduction so fc1 has >= 1 output channel:
    # channels=64, reduction=16 -> hidden=4.
    B, C, reduction = 2, 64, 16
    key = jax.random.PRNGKey(0)
    kx, kp = jax.random.split(key)
    params = init_params(kp, C, reduction)

    # 1) Default path: small feature map -> batch-blocked full-spatial blocks.
    x = jax.random.normal(kx, (B, C, 16, 16), jnp.float32)
    out = jax.block_until_ready(se_weight_pallas(x, *params))
    ref = se_weight_ref(x, *params)
    assert out.shape == (B, C, 1, 1)
    assert jnp.allclose(out, ref, atol=1e-5, rtol=1e-5), (
        f"max abs err {float(jnp.max(jnp.abs(out - ref)))}")

    # 2) Forced spatial-tiling path with a masked partial tail tile (HW=49).
    x2 = jax.random.normal(kx, (B, C, 7, 7), jnp.float32)
    out2 = jax.block_until_ready(se_weight_pallas(x2, *params, block_bytes=8 * 1024))
    ref2 = se_weight_ref(x2, *params)
    assert jnp.allclose(out2, ref2, atol=1e-5, rtol=1e-5), (
        f"max abs err (masked tail) {float(jnp.max(jnp.abs(out2 - ref2)))}")

    # 3) Forced multi-tile spatial path, HW not a multiple of 128 (HW=272).
    x3 = jax.random.normal(kx, (B, C, 16, 17), jnp.float32)
    out3 = jax.block_until_ready(se_weight_pallas(x3, *params, block_bytes=32 * 1024))
    ref3 = se_weight_ref(x3, *params)
    assert jnp.allclose(out3, ref3, atol=1e-5, rtol=1e-5), (
        f"max abs err (multi-tile) {float(jnp.max(jnp.abs(out3 - ref3)))}")

    print("KERNEL_OK")
</pallas_src>

<mosaic_0001>
module attributes {stable_mosaic.version = 11 : i64} {
  func.func @_se_batched_kernel(%arg0: i32, %arg1: memref<2x64x256xf32, #tpu.memory_space<vmem>>, %arg2: memref<64x4xf32, #tpu.memory_space<vmem>>, %arg3: memref<1x4xf32, #tpu.memory_space<vmem>>, %arg4: memref<4x64xf32, #tpu.memory_space<vmem>>, %arg5: memref<1x64xf32, #tpu.memory_space<vmem>>, %arg6: memref<2x64xf32, #tpu.memory_space<vmem>>) attributes {dimension_semantics = [#tpu.dimension_semantics<parallel>], iteration_bounds = array<i64: 1>, scalar_prefetch = 0 : i64, scratch_operands = 0 : i64, tpu.core_type = #tpu.core_type<tc>, window_params = [{transform_indices = @transform_0, window_bounds = array<i64: 2, 64, 256>}, {pipeline_mode = #tpu.pipeline_mode<synchronous>, transform_indices = @transform_1, window_bounds = array<i64: 64, 4>}, {pipeline_mode = #tpu.pipeline_mode<synchronous>, transform_indices = @transform_2, window_bounds = array<i64: 1, 4>}, {pipeline_mode = #tpu.pipeline_mode<synchronous>, transform_indices = @transform_3, window_bounds = array<i64: 4, 64>}, {pipeline_mode = #tpu.pipeline_mode<synchronous>, transform_indices = @transform_4, window_bounds = array<i64: 1, 64>}, {transform_indices = @transform_5, window_bounds = array<i64: 2, 64>}]} {
    %c0 = arith.constant 0 : index
    %c0_0 = arith.constant 0 : index
    %c0_1 = arith.constant 0 : index
    %0 = vector.load %arg1[%c0, %c0_0, %c0_1] : memref<2x64x256xf32, #tpu.memory_space<vmem>>, vector<2x64x256xf32>
    %cst = arith.constant dense<0.000000e+00> : vector<2x64xf32>
    %1 = vector.multi_reduction <add>, %0, %cst [2] : vector<2x64x256xf32> to vector<2x64xf32>
    %cst_2 = arith.constant 3.906250e-03 : f32
    %2 = vector.broadcast %cst_2 : f32 to vector<2x64xf32>
    %3 = arith.mulf %1, %2 : vector<2x64xf32>
    %c0_3 = arith.constant 0 : index
    %c0_4 = arith.constant 0 : index
    %4 = vector.load %arg2[%c0_3, %c0_4] : memref<64x4xf32, #tpu.memory_space<vmem>>, vector<64x4xf32>
    %cst_5 = arith.constant dense<0.000000e+00> : vector<2x4xf32>
    %5 = tpu.matmul %3, %4, %cst_5 {dimension_numbers = #tpu.dot_dimension_numbers<[1], [0], [0], [1], [0, 0, 1, 1], [], []>} : vector<2x64xf32>, vector<64x4xf32>, vector<2x4xf32> -> vector<2x4xf32>
    %c0_6 = arith.constant 0 : index
    %c0_7 = arith.constant 0 : index
    %6 = vector.load %arg3[%c0_6, %c0_7] : memref<1x4xf32, #tpu.memory_space<vmem>>, vector<1x4xf32>
    %7 = vector.broadcast %6 : vector<1x4xf32> to vector<2x4xf32>
    %8 = arith.addf %5, %7 : vector<2x4xf32>
    %cst_8 = arith.constant 0.000000e+00 : f32
    %9 = vector.broadcast %cst_8 : f32 to vector<2x4xf32>
    %10 = arith.maximumf %8, %9 : vector<2x4xf32>
    %c0_9 = arith.constant 0 : index
    %c0_10 = arith.constant 0 : index
    %11 = vector.load %arg4[%c0_9, %c0_10] : memref<4x64xf32, #tpu.memory_space<vmem>>, vector<4x64xf32>
    %cst_11 = arith.constant dense<0.000000e+00> : vector<2x64xf32>
    %12 = tpu.matmul %10, %11, %cst_11 {dimension_numbers = #tpu.dot_dimension_numbers<[1], [0], [0], [1], [0, 0, 1, 1], [], []>} : vector<2x4xf32>, vector<4x64xf32>, vector<2x64xf32> -> vector<2x64xf32>
    %c0_12 = arith.constant 0 : index
    %c0_13 = arith.constant 0 : index
    %13 = vector.load %arg5[%c0_12, %c0_13] : memref<1x64xf32, #tpu.memory_space<vmem>>, vector<1x64xf32>
    %14 = vector.broadcast %13 : vector<1x64xf32> to vector<2x64xf32>
    %15 = arith.addf %12, %14 : vector<2x64xf32>
    %16 = arith.negf %15 : vector<2x64xf32>
    %17 = math.exp %16 : vector<2x64xf32>
    %cst_14 = arith.constant 1.000000e+00 : f32
    %18 = vector.broadcast %cst_14 : f32 to vector<2x64xf32>
    %19 = arith.addf %18, %17 : vector<2x64xf32>
    %20 = arith.divf %18, %19 : vector<2x64xf32>
    %c0_15 = arith.constant 0 : index
    %c0_16 = arith.constant 0 : index
    %21 = vector.load %arg6[%c0_15, %c0_16] : memref<2x64xf32, #tpu.memory_space<vmem>>, vector<2x64xf32>
    tpu.vector_store %arg6[%c0_15, %c0_16], %20 {strides = array<i32>} : memref<2x64xf32, #tpu.memory_space<vmem>>, vector<2x64xf32>,
    return
  }
  func.func @transform_0(%arg0: i32) -> (i32, i32, i32) {
    %c0_i32 = arith.constant 0 : i32
    %c0_i32_0 = arith.constant 0 : i32
    %c0_i32_1 = arith.constant 0 : i32
    return %arg0, %c0_i32, %c0_i32_0 : i32, i32, i32
  }
  func.func @transform_1(%arg0: i32) -> (i32, i32) {
    %c0_i32 = arith.constant 0 : i32
    %c0_i32_0 = arith.constant 0 : i32
    %c0_i32_1 = arith.constant 0 : i32
    return %c0_i32, %c0_i32_0 : i32, i32
  }
  func.func @transform_2(%arg0: i32) -> (i32, i32) {
    %c0_i32 = arith.constant 0 : i32
    %c0_i32_0 = arith.constant 0 : i32
    %c0_i32_1 = arith.constant 0 : i32
    return %c0_i32, %c0_i32_0 : i32, i32
  }
  func.func @transform_3(%arg0: i32) -> (i32, i32) {
    %c0_i32 = arith.constant 0 : i32
    %c0_i32_0 = arith.constant 0 : i32
    %c0_i32_1 = arith.constant 0 : i32
    return %c0_i32, %c0_i32_0 : i32, i32
  }
  func.func @transform_4(%arg0: i32) -> (i32, i32) {
    %c0_i32 = arith.constant 0 : i32
    %c0_i32_0 = arith.constant 0 : i32
    %c0_i32_1 = arith.constant 0 : i32
    return %c0_i32, %c0_i32_0 : i32, i32
  }
  func.func @transform_5(%arg0: i32) -> (i32, i32) {
    %c0_i32 = arith.constant 0 : i32
    %c0_i32_0 = arith.constant 0 : i32
    return %arg0, %c0_i32 : i32, i32
  }
}

</mosaic_0001>

<bundles_post_ra>
// kernel: se_weight_pallas.1
= control target key start
LH: loop header
LB: loop body
LE: loop exit
PB: predicated region body
PF: predicated region fallthrough
CT: control target
= control target key end

     0   :  { %s698_s0 = inlined_call_operand.vmem [shape: f32[2,64,256], index: 0, kind: input, shape index: {}]   ;;  %s699_s1 = inlined_call_operand.vmem [shape: f32[64,4], index: 1, kind: input, shape index: {}]   ;;  %s700_s2 = inlined_call_operand.vmem [shape: f32[1,4], index: 2, kind: input, shape index: {}]   ;;  %s701_s3 = inlined_call_operand.vmem [shape: f32[4,64], index: 3, kind: input, shape index: {}]   ;;  %s702_s4 = inlined_call_operand.vmem [shape: f32[1,64], index: 4, kind: input, shape index: {}]   ;;  %s703_s5 = inlined_call_operand.hbm [shape: f32[2,64], index: 5, kind: output, shape index: {}]  }
   0x1   :  { %v37_v0 = vld [vmem:[%s698_s0 + $0x80] sm:$0xff]  ;;  %v38_v1 = vld [vmem:[%s698_s0 + $0x88] sm:$0xff]  ;;  %v39_v5 = vld [vmem:[%s698_s0 + $0x90] sm:$0xff] }
   0x2   :  { %v21_v2 = vld [vmem:[%s698_s0] sm:$0xff]  ;;  %v77_v3 = vadd.f32 %v38_v1, %v37_v0  ;;  %v22_v4 = vld [vmem:[%s698_s0 + $0x8] sm:$0xff]  ;;  %v40_v6 = vld [vmem:[%s698_s0 + $0x98] sm:$0xff] }
   0x3   :  { %v53_v7 = vadd.f32 %v22_v4, %v21_v2  ;;  %v23_v8 = vld [vmem:[%s698_s0 + $0x10] sm:$0xff]  ;;  %v24_v9 = vld [vmem:[%s698_s0 + $0x18] sm:$0xff]  ;;  %v80_v10 = vadd.f32 %v40_v6, %v39_v5  ;;  %v41_v12 = vld [vmem:[%s698_s0 + $0xa0] sm:$0xff] }
   0x4   :  { %78 = vadd.xlane.f32.xlu1 %v77_v3  ;;  %v56_v11 = vadd.f32 %v24_v9, %v23_v8  ;;  %v42_v13 = vld [vmem:[%s698_s0 + $0xa8] sm:$0xff]  ;;  %v25_v14 = vld [vmem:[%s698_s0 + $0x20] sm:$0xff]  ;;  %v43_v18 = vld [vmem:[%s698_s0 + $0xb0] sm:$0xff] }
   0x5   :  { %54 = vadd.xlane.f32.xlu0 %v53_v7  ;;  %v26_v15 = vld [vmem:[%s698_s0 + $0x28] sm:$0xff]  ;;  %v83_v16 = vadd.f32 %v42_v13, %v41_v12  ;;  %v44_v19 = vld [vmem:[%s698_s0 + $0xb8] sm:$0xff]  ;;  %v27_v20 = vld [vmem:[%s698_s0 + $0x30] sm:$0xff] }
   0x6   :  { %v59_v17 = vadd.f32 %v26_v15, %v25_v14  ;;  %v28_v21 = vld [vmem:[%s698_s0 + $0x38] sm:$0xff] }
   0x8   :  { %81 = vadd.xlane.f32.xlu1 %v80_v10 }
   0x9   :  { %57 = vadd.xlane.f32.xlu0 %v56_v11 }
   0xa   :  { %10 = vsyncpa [#allocation3], 0  ;;  %v86_v22 = vadd.f32 %v44_v19, %v43_v18  ;;  %v62_v23 = vadd.f32 %v28_v21, %v27_v20  ;;  %v45_v24 = vld [vmem:[%s698_s0 + $0xc0] sm:$0xff]  ;;  %v46_v25 = vld [vmem:[%s698_s0 + $0xc8] sm:$0xff]  ;;  %v511_v51 = vmov 0.0|0.0   ;;  %vm512_vm0 = vmmov 0  }
   0xb   :  { %v29_v26 = vld [vmem:[%s698_s0 + $0x40] sm:$0xff]  ;;  %v30_v27 = vld [vmem:[%s698_s0 + $0x48] sm:$0xff]  ;;  %v89_v28 = vadd.f32 %v46_v25, %v45_v24  ;;  %v47_v30 = vld [vmem:[%s698_s0 + $0xd0] sm:$0xff]  ;;  %467 = vmatprep.subr.bf16.mxu0 %v511_v51  ;;  %v513_v61 = vmov 0.0   ;;  %v148_v2 = vlaneseq  ;;  %vm159_vm1 = vcmask 130112  }
   0xc   :  { %84 = vadd.xlane.f32.xlu1 %v83_v16  ;;  %v65_v29 = vadd.f32 %v30_v27, %v29_v26  ;;  %v48_v31 = vld [vmem:[%s698_s0 + $0xd8] sm:$0xff]  ;;  %v31_v32 = vld [vmem:[%s698_s0 + $0x50] sm:$0xff]  ;;  %v49_v36 = vld [vmem:[%s698_s0 + $0xe0] sm:$0xff]  ;;  %459 = vmatprep.mubr.msk.f32.mxu0 %vm512_vm0, %v513_v61  ;;  %vm166_vm2 = vcmask 195712   ;;  %vm173_vm3 = vcmask 261312   ;;  %vm180_vm4 = vcmask 326912  }
   0xd   :  { %60 = vadd.xlane.f32.xlu0 %v59_v17  ;;  %v32_v33 = vld [vmem:[%s698_s0 + $0x58] sm:$0xff]  ;;  %v92_v34 = vadd.f32 %v48_v31, %v47_v30  ;;  %v50_v37 = vld [vmem:[%s698_s0 + $0xe8] sm:$0xff]  ;;  %v33_v38 = vld [vmem:[%s698_s0 + $0x60] sm:$0xff]  ;;  %462 = vmatprep.subr.mxu1 %v513_v61  ;;  %v149_v5 = vand.u32 127, %v148_v2  ;;  %v151_v7 = vshrl.u32 %v148_v2, 7  ;;  %vm187_vm5 = vcmask 392512  }
   0xe   :  { %v68_v35 = vadd.f32 %v32_v33, %v31_v32  ;;  %v34_v39 = vld [vmem:[%s698_s0 + $0x68] sm:$0xff]  ;;  %v95_v40 = vadd.f32 %v50_v37, %v49_v36  ;;  %v51_v42 = vld [vmem:[%s698_s0 + $0xf0] sm:$0xff]  ;;  %v52_v43 = vld [vmem:[%s698_s0 + $0xf8] sm:$0xff]  ;;  %464 = vmatprep.mubr.msk.f32.mxu1 %vm512_vm0, %v513_v61  ;;  %vm194_vm6 = vcmask 458112   ;;  %vm201_vm7 = vcmask 523712  }
   0xf   :  { %v71_v41 = vadd.f32 %v34_v39, %v33_v38  ;;  %v35_v44 = vld [vmem:[%s698_s0 + $0x70] sm:$0xff]  ;;  %v36_v45 = vld [vmem:[%s698_s0 + $0x78] sm:$0xff]  ;;  %v98_v46 = vadd.f32 %v52_v43, %v51_v42  ;;  %v117_v48 = vld [vmem:[%s699_s1] sm:$0xff]  ;;  %v154_v9 = vadd.s32 4294967288, %v149_v5  ;;  %v161_v10 = vadd.s32 4294967280, %v149_v5 }
  0x10   :  { %87 = vadd.xlane.f32.xlu1 %v86_v22  ;;  %v74_v47 = vadd.f32 %v36_v45, %v35_v44  ;;  %v118_v49 = vld [vmem:[%s699_s1 + $0x8] sm:$0xff]  ;;  %v119_v52 = vld [vmem:[%s699_s1 + $0x10] sm:$0xff]  ;;  %v120_v53 = vld [vmem:[%s699_s1 + $0x18] sm:$0xff]  ;;  %v168_v11 = vadd.s32 4294967272, %v149_v5  ;;  %v175_v12 = vadd.s32 4294967264, %v149_v5  ;;  %v182_v14 = vadd.s32 4294967256, %v149_v5 }
  0x11   :  { %63 = vadd.xlane.f32.xlu0 %v62_v23  ;;  %v468_v50 = vpack.c.bf16 %v118_v49, %v117_v48  ;;  %v471_v54 = vpack.c.bf16 %v120_v53, %v119_v52  ;;  %v121_v55 = vld [vmem:[%s699_s1 + $0x20] sm:$0xff]  ;;  %v122_v56 = vld [vmem:[%s699_s1 + $0x28] sm:$0xff]  ;;  %v123_v58 = vld [vmem:[%s699_s1 + $0x30] sm:$0xff]  ;;  %v152_v15 = vsub.s32 %v149_v5, %v151_v7  ;;  %v157_v17 = vsub.s32 %v154_v9, %v151_v7 }
  0x12   :  { %v474_v57 = vpack.c.bf16 %v122_v56, %v121_v55  ;;  %v124_v59 = vld [vmem:[%s699_s1 + $0x38] sm:$0xff]  ;;  %v164_v18 = vsub.s32 %v161_v10, %v151_v7  ;;  %v189_v19 = vadd.s32 4294967248, %v149_v5  ;;  %v171_v21 = vsub.s32 %v168_v11, %v151_v7 }
  0x13   :  { %469 = vmatpush3.bf16.msra.mxu0 %v468_v50  ;;  %v477_v60 = vpack.c.bf16 %v124_v59, %v123_v58  ;;  %v178_v22 = vsub.s32 %v175_v12, %v151_v7  ;;  %v185_v25 = vsub.s32 %v182_v14, %v151_v7  ;;  %v196_v38 = vadd.s32 4294967240, %v149_v5 }
  0x14   :  { %90 = vadd.xlane.f32.xlu1 %v89_v28  ;;  %470 = vmatprep.subr.bf16.mxu0 %v511_v51  ;;  %vm242_vm8 = vcmask 1041409   ;;  %vm244_vm9 = vcmask 523264   ;;  %vm330_vm10 = vcmask 1043456   ;;  %vm326_vm11 = vcmask 31744  }
  0x15   :  { %66 = vadd.xlane.f32.xlu0 %v65_v29  ;;  %v199_v55 = vsub.s32 %v196_v38, %v151_v7  ;;  %vm410_vm12 = vcmask 517120  }
  0x17   :  { %472 = vmatpush3.bf16.msra.mxu0 %v471_v54 }
  0x18   :  { %93 = vadd.xlane.f32.xlu1 %v92_v34  ;;  %473 = vmatprep.subr.bf16.mxu0 %v511_v51  ;;  %v192_v34 = vsub.s32 %v189_v19, %v151_v7 }
  0x19   :  { %69 = vadd.xlane.f32.xlu0 %v68_v35 }
  0x1b   :  { %475 = vmatpush3.bf16.msra.mxu0 %v474_v57 }
  0x1c   :  { %96 = vadd.xlane.f32.xlu1 %v95_v40  ;;  %476 = vmatprep.subr.bf16.mxu0 %v511_v51 }
  0x1d   :  { %72 = vadd.xlane.f32.xlu0 %v71_v41 }
  0x1f   :  { %478 = vmatpush3.bf16.msra.mxu0 %v477_v60 }
  0x20   :  { %99 = vadd.xlane.f32.xlu1 %v98_v46 }
  0x21   :  { %75 = vadd.xlane.f32.xlu0 %v74_v47 }
  0x91   :  { %v79_v62 = vpop.xlane.xlu1 %78 }
  0x92   :  { %v55_v63 = vpop.xlane.xlu0 %54  ;;  %v109_v27 = vmul.f32 0.00390625, %v79_v62 }
  0x93   :  { %v101_v31 = vmul.f32 0.00390625, %v55_v63 }
  0x94   :  { %v206_v43 = vrot.slane %v109_v27, %v152_v15 }
  0x95   :  { %v82_v0 = vpop.xlane.xlu1 %81  ;;  %v153_v48 = vrot.slane %v101_v31, %v152_v15  ;;  %v318_v15 = vld [vmem:[%s701_s3] sm:$0xf]  ;;  %s514_s3 = smov [#allocation2]  }
  0x96   :  { %v58_v1 = vpop.xlane.xlu0 %57  ;;  %v110_v20 = vmul.f32 0.00390625, %v82_v0  ;;  %463 = vmatpush3.msk.msra.mxu1 %vm330_vm10, %v318_v15 }
  0x97   :  { %v102_v23 = vmul.f32 0.00390625, %v58_v1 }
  0x98   :  { %v210_v35 = vrot.slane %v110_v20, %v157_v17 }
  0x99   :  { %v85_v3 = vpop.xlane.xlu1 %84  ;;  %v158_v39 = vrot.slane %v102_v23, %v157_v17 }
  0x9a   :  { %v61_v4 = vpop.xlane.xlu0 %60  ;;  %v111_v24 = vmul.f32 0.00390625, %v85_v3  ;;  %v211_v52 = vsel %vm159_vm1, %v210_v35, %v206_v43 }
  0x9b   :  { %v103_v28 = vmul.f32 0.00390625, %v61_v4  ;;  %v160_v56 = vsel %vm159_vm1, %v158_v39, %v153_v48 }
  0x9c   :  { %v215_v40 = vrot.slane %v111_v24, %v164_v18 }
  0x9d   :  { %v88_v6 = vpop.xlane.xlu1 %87  ;;  %v165_v44 = vrot.slane %v103_v28, %v164_v18 }
  0x9e   :  { %v64_v8 = vpop.xlane.xlu0 %63  ;;  %v112_v29 = vmul.f32 0.00390625, %v88_v6  ;;  %v216_v57 = vsel %vm166_vm2, %v215_v40, %v211_v52 }
  0x9f   :  { %v104_v32 = vmul.f32 0.00390625, %v64_v8  ;;  %v167_v61 = vsel %vm166_vm2, %v165_v44, %v160_v56 }
  0xa0   :  { %v220_v45 = vrot.slane %v112_v29, %v171_v21 }
  0xa1   :  { %v91_v13 = vpop.xlane.xlu1 %90  ;;  %v172_v49 = vrot.slane %v104_v32, %v171_v21  ;;  %v428_v21 = vld [vmem:[%s702_s4] ss:$0 sm:$0xff] }
  0xa2   :  { %v67_v16 = vpop.xlane.xlu0 %66  ;;  %v113_v33 = vmul.f32 0.00390625, %v91_v13  ;;  %v221_v62 = vsel %vm173_vm3, %v220_v45, %v216_v57 }
  0xa3   :  { %v105_v36 = vmul.f32 0.00390625, %v67_v16  ;;  %v174_v2 = vsel %vm173_vm3, %v172_v49, %v167_v61  ;;  %v426_v16 = vld [vmem:[%s700_s2] ss:$0 sm:$0xff]  ;;  %s418_s2 = sshll.u32 %s514_s3, 4  ;;  %s419_s2 = int_to_ptr.vmem [resolvable:$true] %s418_s2 }
  0xa4   :  { %v225_v50 = vrot.slane %v113_v33, %v178_v22  ;;  %s487_s27 = scalar_lea.vmem %s419_s2, 32  ;;  %p492_p1 = scmp.lt.s32.totalorder %s419_s2, %s419_s2 }
  0xa5   :  { %v94_v26 = vpop.xlane.xlu1 %93  ;;  %v179_v53 = vrot.slane %v105_v36, %v178_v22  ;;  %p488_p0 = scmp.ne.s32.totalorder %s419_s2, %s487_s27  ;;  %p493_p2 = scmp.lt.s32.totalorder %s487_s27, %s487_s27 }
  0xa6   :  { %v70_v30 = vpop.xlane.xlu0 %69  ;;  %v114_v37 = vmul.f32 0.00390625, %v94_v26  ;;  %v226_v3 = vsel %vm180_vm4, %v225_v50, %v221_v62 }
  0xa7   :  { %v106_v41 = vmul.f32 0.00390625, %v70_v30  ;;  %v181_v5 = vsel %vm180_vm4, %v179_v53, %v174_v2  ;;  %p494_p3 = por %p493_p2, %p492_p1 }
  0xa8   :  { %v230_v54 = vrot.slane %v114_v37, %v185_v25 }
  0xa9   :  { %v97_v42 = vpop.xlane.xlu1 %96  ;;  %v186_v58 = vrot.slane %v106_v41, %v185_v25  ;;  %p495_p4 = pnand %p494_p3, %p488_p0 }
  0xaa   :  { %v115_v46 = vmul.f32 0.00390625, %v97_v42  ;;  %v73_v47 = vpop.xlane.xlu0 %72  ;;  %v231_v6 = vsel %vm187_vm5, %v230_v54, %v226_v3 }
  0xab   :  { %v107_v51 = vmul.f32 0.00390625, %v73_v47  ;;  %v188_v8 = vsel %vm187_vm5, %v186_v58, %v181_v5 }
  0xac   :  { %v235_v59 = vrot.slane %v115_v46, %v192_v34 }
  0xad   :  { %v100_v60 = vpop.xlane.xlu1 %99  ;;  %v193_v63 = vrot.slane %v107_v51, %v192_v34 }
  0xae   :  { %v116_v0 = vmul.f32 0.00390625, %v100_v60  ;;  %v76_v1 = vpop.xlane.xlu0 %75  ;;  %v236_v9 = vsel %vm194_vm6, %v235_v59, %v231_v6 }
  0xaf   :  { %v108_v4 = vmul.f32 0.00390625, %v76_v1  ;;  %v195_v11 = vsel %vm194_vm6, %v193_v63, %v188_v8 }
  0xb0   :  { %v240_v7 = vrot.slane %v116_v0, %v199_v55 }
  0xb1   :  { %v200_v10 = vrot.slane %v108_v4, %v199_v55 }
  0xb2   :  { %v241_v12 = vsel %vm201_vm7, %v240_v7, %v236_v9 }
  0xb3   :  { %v202_v13 = vsel %vm201_vm7, %v200_v10, %v195_v11 }
  0xb4   :  { %v243_v14 = vsel %vm242_vm8, %v241_v12, %v202_v13 }
  0xb5   :  { %460 = vmatmul.mubr.msk.f32.vlgmr.msra.gmra.mrb[0].mxu0 %vm244_vm9, %v243_v14 }
 0x188   :  { %v313_v17 = vpop.f32.mrb[0].mxu0 }
 0x189   :  { %v314_v18 = vadd.f32 %v426_v16, %v313_v17  ;;  %v461_v19 = vpop.f32.mrb[1].mxu0 }
 0x18b   :  { %v317_v20 = vmax.f32 %v314_v18, 0.0 }
 0x18d   :  { %465 = vmatmul.mubr.msk.f32.vlgmr.msra.gmra.mrb[0].mxu1 %vm326_vm11, %v317_v20 }
 0x260   :  { %v400_v22 = vpop.f32.mrb[0].mxu1 }
 0x261   :  { %v401_v23 = vadd.f32 %v428_v21, %v400_v22  ;;  %v466_v24 = vpop.f32.mrb[1].mxu1 }
 0x263   :  { %v431_v25 = vmul.f32 -1.442695, %v401_v23 }
 0x265   :  { %483 = vpow2.f32 %v431_v25 }
 0x26f   :  { %v484_v26 = vpop.eup %483 }
 0x270   :  { %v407_v27 = vadd.f32 1.0, %v484_v26 }
 0x272   :  { %485 = vrcp.f32 %v407_v27 }
 0x27c   :  { %v486_v28 = vpop.eup %485 }
 0x27d   :  { %411 = vst.msk [vmem:[#allocation2] sm:$0x3] %vm410_vm12, %v486_v28 }
 0x27e   :  { %498 = shalt.err (!%p495_p4)
}
 0x27f   :  { %s499_s29 = scalar_lea.hbm %s703_s5, 32 }
 0x280   :  { %p500_p5 = scmp.ne.s32.totalorder %s703_s5, %s499_s29  ;;  %p503_p6 = scmp.lt.u32.totalorder %s499_s29, %s703_s5 }
 0x282   :  { %p505_p7 = pnand %p503_p6, %p500_p5 }
 0x284   :  { %508 = shalt.err (!%p505_p7)
}
 0x285   :  { %421 = dma.vmem_to_hbm [thread:$0]  %s419_s2, 32, %s703_s5, [#allocation3]  }
 0x286   :  { %509 = dma.done.wait [#allocation3], 32  }
 0x287   :  { %510 = vsyncadd [#allocation3], 4294967264 }
 0x288   :  { %425 = vsyncpa [#allocation3], 1 }

</bundles_post_ra>
